<compile_context>
chip_gen: v6e
topology: v6e:2x2x1
jax: 0.10.0
libtpu: 0.0.40
codegen_flags: <defaults>
</compile_context>

<pallas_src>
import jax
import jax.numpy as jnp
from jax import lax
from jax.experimental import pallas as pl
from jax.experimental.pallas import tpu as pltpu


def conv3x3_relu_kernel(w_ref, b_ref, x_ref, o_ref, xp_ref):
    # w_ref:  (9,) f32 in SMEM  (flattened 3x3 kernel, row-major)
    # b_ref:  (1,) f32 in SMEM
    # x_ref:  (tN, H, W)       f32 in VMEM (unpadded input tile)
    # o_ref:  (tN, H, W)       f32 in VMEM
    # xp_ref: (tN, H+2, W+2)   f32 VMEM scratch (zero-padded copy, built here)
    tN, H, W = o_ref.shape

    # In-VMEM zero padding: zero the scratch, then copy the tile into the
    # interior window. No padded array ever touches HBM.
    # (Re-zeroed every grid step so it is correct under megacore sharding.)
    xp_ref[...] = jnp.zeros_like(xp_ref)
    xp_ref[:, 1:H + 1, 1:W + 1] = x_ref[...]

    acc = jnp.zeros((tN, H, W), jnp.float32)
    # 3 lane-offset views (one per column offset dj), then 3 sublane slices
    # each — cuts the lane-unaligned work from 9 accesses to 3.
    for dj in range(3):
        c = xp_ref[:, :, dj:dj + W]          # (tN, H+2, W): lane-shifted view
        for di in range(3):
            w = w_ref[di * 3 + dj]           # scalar weight from SMEM
            acc = acc + w * c[:, di:di + H, :]
    acc = acc + b_ref[0]
    o_ref[...] = jnp.maximum(acc, 0.0).astype(o_ref.dtype)


def conv3x3_relu(x, weight, bias, *, vmem_block_budget_bytes=2 << 20):
    """x: (N, 1, H, W) f32, weight: (1, 1, 3, 3) f32, bias: (1,) f32."""
    N, C, H, W = x.shape
    assert C == 1
    x2 = x[:, 0].astype(jnp.float32)                  # (N, H, W), no padding
    w_flat = weight.reshape(9).astype(jnp.float32)
    b_flat = bias.reshape(1).astype(jnp.float32)

    # Batch tile: largest divisor of N whose input block stays under the
    # budget, but keep >= 2 grid steps when N > 1 so the software pipeline
    # can overlap DMA with compute.
    bytes_per_image = H * W * 4
    tn = max(1, min(N, vmem_block_budget_bytes // max(bytes_per_image, 1)))
    while N % tn:
        tn -= 1
    if tn == N and N > 1:
        tn = N // 2
        while N % tn:
            tn -= 1
    grid = (N // tn,)

    out = pl.pallas_call(
        conv3x3_relu_kernel,
        out_shape=jax.ShapeDtypeStruct((N, H, W), jnp.float32),
        grid=grid,
        in_specs=[
            pl.BlockSpec(memory_space=pltpu.SMEM),              # weights (9,)
            pl.BlockSpec(memory_space=pltpu.SMEM),              # bias (1,)
            pl.BlockSpec((tn, H, W), lambda i: (i, 0, 0)),      # input tile
        ],
        out_specs=pl.BlockSpec((tn, H, W), lambda i: (i, 0, 0)),
        scratch_shapes=[pltpu.VMEM((tn, H + 2, W + 2), jnp.float32)],
        compiler_params=pltpu.CompilerParams(
            dimension_semantics=("parallel",),   # megacore sharding on v7x
        ),
    )(w_flat, b_flat, x2)

    return out[:, None, :, :]                                  # back to NCHW


if __name__ == "__main__":
    key = jax.random.PRNGKey(0)
    N, C, H, W = 2, 1, 16, 16
    x = jax.random.normal(key, (N, C, H, W), dtype=jnp.float32)

    # Deterministic parameters, matching Model.__init__:
    #   conv.weight.data.fill_(1); conv.bias.data.fill_(0)
    weight = jnp.ones((1, 1, 3, 3), dtype=jnp.float32)
    bias = jnp.zeros((1,), dtype=jnp.float32)

    y = conv3x3_relu(x, weight, bias)
    y = jax.block_until_ready(y)

    # Reference check (plain JAX conv, NCHW / OIHW, SAME padding) + ReLU.
    ref = lax.conv_general_dilated(
        x, weight, window_strides=(1, 1), padding="SAME",
        dimension_numbers=("NCHW", "OIHW", "NCHW"))
    ref = jnp.maximum(ref + bias.reshape(1, 1, 1, 1), 0.0)
    assert y.shape == (N, C, H, W)
    assert jnp.allclose(y, ref, atol=1e-5, rtol=1e-5)

    print("KERNEL_OK")
</pallas_src>

<mosaic_0001>
module attributes {stable_mosaic.version = 11 : i64} {
  func.func @conv3x3_relu_kernel(%arg0: i32, %arg1: memref<9xf32, #tpu.memory_space<smem>>, %arg2: memref<1xf32, #tpu.memory_space<smem>>, %arg3: memref<1x16x16xf32, #tpu.memory_space<vmem>>, %arg4: memref<1x16x16xf32, #tpu.memory_space<vmem>>, %arg5: memref<1x18x18xf32, #tpu.memory_space<vmem>>) attributes {dimension_semantics = [#tpu.dimension_semantics<parallel>], iteration_bounds = array<i64: 2>, scalar_prefetch = 0 : i64, scratch_operands = 1 : i64, tpu.core_type = #tpu.core_type<tc>, window_params = [{transform_indices = @transform_0, window_bounds = array<i64: 9>}, {transform_indices = @transform_1, window_bounds = array<i64: 1>}, {transform_indices = @transform_2, window_bounds = array<i64: 1, 16, 16>}, {transform_indices = @transform_3, window_bounds = array<i64: 1, 16, 16>}]} {
    %cst = arith.constant 0.000000e+00 : f32
    %0 = vector.broadcast %cst : f32 to vector<1x18x18xf32>
    %c0 = arith.constant 0 : index
    %c0_0 = arith.constant 0 : index
    %c0_1 = arith.constant 0 : index
    %1 = vector.load %arg5[%c0, %c0_0, %c0_1] : memref<1x18x18xf32, #tpu.memory_space<vmem>>, vector<1x18x18xf32>
    tpu.vector_store %arg5[%c0, %c0_0, %c0_1], %0 {strides = array<i32>} : memref<1x18x18xf32, #tpu.memory_space<vmem>>, vector<1x18x18xf32>,
    %c0_2 = arith.constant 0 : index
    %c0_3 = arith.constant 0 : index
    %c0_4 = arith.constant 0 : index
    %2 = vector.load %arg3[%c0_2, %c0_3, %c0_4] : memref<1x16x16xf32, #tpu.memory_space<vmem>>, vector<1x16x16xf32>
    %c0_5 = arith.constant 0 : index
    %c1 = arith.constant 1 : index
    %c1_6 = arith.constant 1 : index
    %3 = vector.load %arg5[%c0_5, %c1, %c1_6] : memref<1x18x18xf32, #tpu.memory_space<vmem>>, vector<1x16x16xf32>
    tpu.vector_store %arg5[%c0_5, %c1, %c1_6], %2 {strides = array<i32>} : memref<1x18x18xf32, #tpu.memory_space<vmem>>, vector<1x16x16xf32>,
    %cst_7 = arith.constant 0.000000e+00 : f32
    %4 = vector.broadcast %cst_7 : f32 to vector<1x16x16xf32>
    %c0_8 = arith.constant 0 : index
    %c0_9 = arith.constant 0 : index
    %c0_10 = arith.constant 0 : index
    %5 = vector.load %arg5[%c0_8, %c0_9, %c0_10] : memref<1x18x18xf32, #tpu.memory_space<vmem>>, vector<1x18x16xf32>
    %c0_11 = arith.constant 0 : index
    %6 = memref.load %arg1[%c0_11] : memref<9xf32, #tpu.memory_space<smem>>
    %7 = vector.extract_strided_slice %5 {offsets = [0, 0, 0], sizes = [1, 16, 16], strides = [1, 1, 1]} : vector<1x18x16xf32> to vector<1x16x16xf32>
    %8 = vector.broadcast %6 : f32 to vector<1x16x16xf32>
    %9 = arith.mulf %8, %7 : vector<1x16x16xf32>
    %10 = arith.addf %4, %9 : vector<1x16x16xf32>
    %c3 = arith.constant 3 : index
    %11 = memref.load %arg1[%c3] : memref<9xf32, #tpu.memory_space<smem>>
    %12 = vector.extract_strided_slice %5 {offsets = [0, 1, 0], sizes = [1, 16, 16], strides = [1, 1, 1]} : vector<1x18x16xf32> to vector<1x16x16xf32>
    %13 = vector.broadcast %11 : f32 to vector<1x16x16xf32>
    %14 = arith.mulf %13, %12 : vector<1x16x16xf32>
    %15 = arith.addf %10, %14 : vector<1x16x16xf32>
    %c6 = arith.constant 6 : index
    %16 = memref.load %arg1[%c6] : memref<9xf32, #tpu.memory_space<smem>>
    %17 = vector.extract_strided_slice %5 {offsets = [0, 2, 0], sizes = [1, 16, 16], strides = [1, 1, 1]} : vector<1x18x16xf32> to vector<1x16x16xf32>
    %18 = vector.broadcast %16 : f32 to vector<1x16x16xf32>
    %19 = arith.mulf %18, %17 : vector<1x16x16xf32>
    %20 = arith.addf %15, %19 : vector<1x16x16xf32>
    %c0_12 = arith.constant 0 : index
    %c0_13 = arith.constant 0 : index
    %c1_14 = arith.constant 1 : index
    %21 = vector.load %arg5[%c0_12, %c0_13, %c1_14] : memref<1x18x18xf32, #tpu.memory_space<vmem>>, vector<1x18x16xf32>
    %c1_15 = arith.constant 1 : index
    %22 = memref.load %arg1[%c1_15] : memref<9xf32, #tpu.memory_space<smem>>
    %23 = vector.extract_strided_slice %21 {offsets = [0, 0, 0], sizes = [1, 16, 16], strides = [1, 1, 1]} : vector<1x18x16xf32> to vector<1x16x16xf32>
    %24 = vector.broadcast %22 : f32 to vector<1x16x16xf32>
    %25 = arith.mulf %24, %23 : vector<1x16x16xf32>
    %26 = arith.addf %20, %25 : vector<1x16x16xf32>
    %c4 = arith.constant 4 : index
    %27 = memref.load %arg1[%c4] : memref<9xf32, #tpu.memory_space<smem>>
    %28 = vector.extract_strided_slice %21 {offsets = [0, 1, 0], sizes = [1, 16, 16], strides = [1, 1, 1]} : vector<1x18x16xf32> to vector<1x16x16xf32>
    %29 = vector.broadcast %27 : f32 to vector<1x16x16xf32>
    %30 = arith.mulf %29, %28 : vector<1x16x16xf32>
    %31 = arith.addf %26, %30 : vector<1x16x16xf32>
    %c7 = arith.constant 7 : index
    %32 = memref.load %arg1[%c7] : memref<9xf32, #tpu.memory_space<smem>>
    %33 = vector.extract_strided_slice %21 {offsets = [0, 2, 0], sizes = [1, 16, 16], strides = [1, 1, 1]} : vector<1x18x16xf32> to vector<1x16x16xf32>
    %34 = vector.broadcast %32 : f32 to vector<1x16x16xf32>
    %35 = arith.mulf %34, %33 : vector<1x16x16xf32>
    %36 = arith.addf %31, %35 : vector<1x16x16xf32>
    %c0_16 = arith.constant 0 : index
    %c0_17 = arith.constant 0 : index
    %c2 = arith.constant 2 : index
    %37 = vector.load %arg5[%c0_16, %c0_17, %c2] : memref<1x18x18xf32, #tpu.memory_space<vmem>>, vector<1x18x16xf32>
    %c2_18 = arith.constant 2 : index
    %38 = memref.load %arg1[%c2_18] : memref<9xf32, #tpu.memory_space<smem>>
    %39 = vector.extract_strided_slice %37 {offsets = [0, 0, 0], sizes = [1, 16, 16], strides = [1, 1, 1]} : vector<1x18x16xf32> to vector<1x16x16xf32>
    %40 = vector.broadcast %38 : f32 to vector<1x16x16xf32>
    %41 = arith.mulf %40, %39 : vector<1x16x16xf32>
    %42 = arith.addf %36, %41 : vector<1x16x16xf32>
    %c5 = arith.constant 5 : index
    %43 = memref.load %arg1[%c5] : memref<9xf32, #tpu.memory_space<smem>>
    %44 = vector.extract_strided_slice %37 {offsets = [0, 1, 0], sizes = [1, 16, 16], strides = [1, 1, 1]} : vector<1x18x16xf32> to vector<1x16x16xf32>
    %45 = vector.broadcast %43 : f32 to vector<1x16x16xf32>
    %46 = arith.mulf %45, %44 : vector<1x16x16xf32>
    %47 = arith.addf %42, %46 : vector<1x16x16xf32>
    %c8 = arith.constant 8 : index
    %48 = memref.load %arg1[%c8] : memref<9xf32, #tpu.memory_space<smem>>
    %49 = vector.extract_strided_slice %37 {offsets = [0, 2, 0], sizes = [1, 16, 16], strides = [1, 1, 1]} : vector<1x18x16xf32> to vector<1x16x16xf32>
    %50 = vector.broadcast %48 : f32 to vector<1x16x16xf32>
    %51 = arith.mulf %50, %49 : vector<1x16x16xf32>
    %52 = arith.addf %47, %51 : vector<1x16x16xf32>
    %c0_19 = arith.constant 0 : index
    %53 = memref.load %arg2[%c0_19] : memref<1xf32, #tpu.memory_space<smem>>
    %54 = vector.broadcast %53 : f32 to vector<1x16x16xf32>
    %55 = arith.addf %52, %54 : vector<1x16x16xf32>
    %cst_20 = arith.constant 0.000000e+00 : f32
    %56 = vector.broadcast %cst_20 : f32 to vector<1x16x16xf32>
    %57 = arith.maximumf %55, %56 : vector<1x16x16xf32>
    %c0_21 = arith.constant 0 : index
    %c0_22 = arith.constant 0 : index
    %c0_23 = arith.constant 0 : index
    %58 = vector.load %arg4[%c0_21, %c0_22, %c0_23] : memref<1x16x16xf32, #tpu.memory_space<vmem>>, vector<1x16x16xf32>
    tpu.vector_store %arg4[%c0_21, %c0_22, %c0_23], %57 {strides = array<i32>} : memref<1x16x16xf32, #tpu.memory_space<vmem>>, vector<1x16x16xf32>,
    return
  }
  func.func @transform_0(%arg0: i32) -> i32 {
    %c0_i32 = arith.constant 0 : i32
    %c0_i32_0 = arith.constant 0 : i32
    return %c0_i32 : i32
  }
  func.func @transform_1(%arg0: i32) -> i32 {
    %c0_i32 = arith.constant 0 : i32
    %c0_i32_0 = arith.constant 0 : i32
    return %c0_i32 : i32
  }
  func.func @transform_2(%arg0: i32) -> (i32, i32, i32) {
    %c0_i32 = arith.constant 0 : i32
    %c0_i32_0 = arith.constant 0 : i32
    %c0_i32_1 = arith.constant 0 : i32
    return %arg0, %c0_i32, %c0_i32_0 : i32, i32, i32
  }
  func.func @transform_3(%arg0: i32) -> (i32, i32, i32) {
    %c0_i32 = arith.constant 0 : i32
    %c0_i32_0 = arith.constant 0 : i32
    %c0_i32_1 = arith.constant 0 : i32
    return %arg0, %c0_i32, %c0_i32_0 : i32, i32, i32
  }
}

</mosaic_0001>

<bundles_post_ra>
// kernel: tpu_custom_call.1
= control target key start
LH: loop header
LB: loop body
LE: loop exit
PB: predicated region body
PF: predicated region fallthrough
CT: control target
= control target key end

     0   :  { %s940_s0 = inlined_call_operand.vmem [shape: f32[9], index: 0, kind: input, shape index: {}]   ;;  %s941_s1 = inlined_call_operand.<no memory space> [shape: f32[1], index: 1, kind: input, shape index: {}]   ;;  %s942_s2 = inlined_call_operand.hbm [shape: f32[2,16,16], index: 2, kind: input, shape index: {}]   ;;  %s943_s3 = inlined_call_operand.hbm [shape: f32[2,16,16], index: 3, kind: output, shape index: {}]  }
   0x1   :  { %8 = sst [smem:[#allocation3]] %s941_s1 }
   0x2   :  { %9 = vsyncpa [#allocation7], 0 }
   0x3   :  { %10 = vsyncpa [#allocation5], 0 }
   0x4   :  { %12 = vsyncpa [#allocation5 + $0x1], 0 }
   0x5   :  { %13 = vsyncpa [#allocation6], 0 }
   0x6   :  { %15 = vsyncpa [#allocation6 + $0x1], 0  ;;  %s725_s14 = smov 0   ;;  %s727_s15 = smov 0  }
   0x7   :  { %s729_s16 = smov 0   ;;  %s731_s17 = smov 0  }
   0x8 LB: > { %s746_s1 = sadd.s32 4294967295, %s689_s17   ;;  %s487_s18 = sadd.s32 4294967294, %s689_s17   ;;  %s689_s17 = sphi %s731_s17, %s965_s17   ;;  %s685_s16 = sphi %s729_s16, %s964_s16   ;;  %s681_s15 = sphi %s727_s15, %s963_s15   ;;  %s677_s14 = sphi %s725_s14, %s962_s14  }
   0x9   : > { %s750_s19 = sadd.s32 1, %s689_s17   ;;  %s70_s20 = sadd.s32 1, %s685_s16 }
   0xa   : > { %s67_s21 = ssub.s32 %s689_s17, %s750_s19  ;;  %p77_p0 = scmp.ne.s32.totalorder %s685_s16, %s681_s15 }
   0xb   : > { %p68_p1 = scmp.eq.s32.totalorder %s67_s21, 0  ;;  %p78_p2 = scmp.eq.s32.totalorder %s689_s17, 0 }
   0xc   : > { %p83_p3 = scmp.ne.s32.totalorder %s681_s15, %s677_s14  ;;  %p945_p4 = scmp.eq.s32.totalorder %s746_s1, 0 }
   0xd   : > { %s762_s22 = scalar_select %p68_p1, %s685_s16, %s70_s20  }
   0xe   : > { %p764_p5 = por %p78_p2, %p77_p0  ;;  %p770_p6 = por %p945_p4, %p83_p3 }
   0xf   : > { %p107_p7 = scmp.eq.s32.totalorder %s746_s1, 1  ;;  %p113_p8 = scmp.eq.s32.totalorder %s487_s18, 1 }
  0x10   : > { %s949_s24 = scalar_select %p770_p6, 1, 0 }
  0x11   : > { %p488_p9 = scmp.ge.s32.totalorder %s689_s17, 1  ;;  %p120_p10 = scmp.lt.s32.totalorder %s689_s17, 3 }
  0x12   : > { %p777_p11 = por %p107_p7, %p77_p0  ;;  %p781_p12 = por %p113_p8, %p83_p3 }
  0x13   : > { %p785_p13 = pnand %p488_p9, %p120_p10  ;;  %s133_s30 = sshll.u32 %s940_s0, 4  ;;  %s134_s30 = int_to_ptr.vmem [resolvable:$true] %s133_s30 }
  0x14   : > { %s950_s25 = scalar_select %p777_p11, 1, 0 }
  0x15   : > { %s951_s26 = scalar_select %p781_p12, 1, 0 }
  0x16   : > { %s952_s27 = scalar_select %p785_p13, 1, 0 }
  0x17   : > { %p521_p1 = pneg %p785_p13  ;;  %p534_p2 = scmp.lt.s32.totalorder %s689_s17, 2 }
  0x18   : > { %s147_s5 = sand.u32 1, %s685_s16   ;;  %s578_s8 = scalar_lea.vmem %s134_s30, 16 }
  0x19   : > { %p798_p7 = pnand %p521_p1, %p945_p4  ;;  %p805_p3 = pnand %p534_p2, %p764_p5 }
  0x1a   : > { %s491_s7 = sshll.u32 %s147_s5, 4  ;;  %p579_p8 = scmp.ne.s32.totalorder %s134_s30, %s578_s8 }
  0x1b   : > { %p580_p9 = pneg %p798_p7  ;;  %p586_p12 = scmp.lt.s32.totalorder %s134_s30, %s134_s30 }
  0x1c   : > { %p587_p11 = scmp.lt.s32.totalorder %s578_s8, %s578_s8 }
  0x1d   : > { %p581_p10 = pnand %p580_p9, %p579_p8 }
  0x1e   : > { %p588_p1 = por %p587_p11, %p586_p12 }
  0x1f   : > { %p582_p0 = pneg %p581_p10 }
  0x21   : > { %p589_p4 = pnand %p588_p1, %p582_p0 }
  0x23   : > { %592 = shalt.err (!%p589_p4)
}
  0x24   : > { %s691_s9 = smov [#allocation4]   ;;  %s511_s10 = sshll.u32 %s689_s17, 8 }
  0x25   : > { %524 = dma.vmem_to_smem (!%p798_p7), %s134_s30, 16, %s691_s9, [#allocation7]  }
  0x26   : > { %s151_s11 = scalar_lea.vmem [#allocation8], %s491_s7  ;;  %s817_s20 = scalar_lea.hbm %s942_s2, %s511_s10 }
  0x27   : > { %s158_s12 = sshll.u32 %s151_s11, 4  ;;  %s821_s21 = scalar_lea.sflag [#allocation5], %s147_s5  ;;  %s819_s12 = int_to_ptr.vmem [resolvable:$true] %s158_s12 }
  0x28   : > { %s593_s23 = scalar_lea.hbm %s817_s20, 256  ;;  %p595_p5 = pneg %p805_p3 }
  0x29   : > { %p594_p4 = scmp.ne.s32.totalorder %s817_s20, %s593_s23  ;;  %s598_s30 = scalar_lea.hbm %s942_s2, 512 }
  0x2a   : > { %p599_p0 = scmp.lt.s32.totalorder %s817_s20, %s942_s2  ;;  %p600_p2 = scmp.lt.s32.totalorder %s598_s30, %s593_s23 }
  0x2b   : > { %p596_p11 = pnand %p595_p5, %p594_p4 }
  0x2c   : > { %p601_p7 = por %p600_p2, %p599_p0 }
  0x2d   : > { %p597_p12 = pneg %p596_p11 }
  0x2f   : > { %p602_p8 = pnand %p601_p7, %p597_p12 }
  0x31   : > { %605 = shalt.err (!%p602_p8)
}
  0x32   : > { %s606_s5 = scalar_lea.vmem %s819_s12, 256  ;;  %s692_s8 = smov [#allocation8]  }
  0x33   : > { %p607_p9 = scmp.ne.s32.totalorder %s819_s12, %s606_s5  ;;  %s611_s9 = sshll.u32 %s692_s8, 4  ;;  %s612_s9 = int_to_ptr.vmem [resolvable:$false] %s611_s9 }
  0x34   : > { %s613_s10 = scalar_lea.vmem %s612_s9, 512  ;;  %p614_p4 = scmp.lt.s32.totalorder %s819_s12, %s612_s9 }
  0x35   : > { %p609_p10 = pnand %p607_p9, %p595_p5  ;;  %p615_p11 = scmp.lt.s32.totalorder %s613_s10, %s606_s5 }
  0x37   : > { %p610_p1 = pneg %p609_p10  ;;  %p616_p6 = por %p615_p11, %p614_p4 }
  0x39   : > { %p617_p13 = pnand %p616_p6, %p610_p1 }
  0x3b   : > { %620 = shalt.err (!%p617_p13)
}
  0x3c   : > { %s693_s11 = smov 128   ;;  %s694_s13 = smov 8  }
  0x3d   : > { %528 = dma.hbm_to_vmem [thread:$0]  (!%p805_p3), %s817_s20, 256, %s819_s12, %s821_s21, %s693_s11, %s693_s11, %s694_s13  }
  0x3e   : > { %p955_p5 = scmp.ne.s32.totalorder %s952_s27, 0 }
  0x3f   : > { %p956_p12 = scmp.eq.s32.totalorder (!%p955_p5), %s746_s1, 0 }
  0x40   : > { %170 = sbr.rel (%p955_p5) target bundleno = 361 (0x169), region = 32 }
  0x45   : > { %664 = dma.done.wait (%p956_p12), [#allocation7], 16   ;;  %p957_p0 = pmov %p956_p12 }
  0x46   : > { %s849_s18 = sand.u32 1, %s681_s15   ;;  %p958_p6 = scmp.ne.s32.totalorder %s949_s24, 0 }
  0x47   : > { %666 = vsyncadd (%p957_p0), [#allocation7], 4294967280  ;;  %s496_s23 = sshll.u32 %s849_s18, 4  ;;  %s177_s28 = scalar_lea.sflag [#allocation5], %s849_s18 }
  0x48   : > { %s180_s6 = scalar_lea.vmem [#allocation8], %s496_s23 }
  0x49   : > { %668 = dma.done.wait (%p958_p6), %s177_s28, 256  }
  0x4a   : > { %670 = vsyncadd (%p958_p6), %s177_s28, 4294967040 }
  0x4b   : > { %185 = sfence }
  0x4c   : > { %v209_v0 = vld [vmem:[%s180_s6] sm:$0xff]  ;;  %vm204_vm0 = vcmask 146432   ;;  %s695_s27 = smov 1   ;;  %v696_v1 = vmov 0.0   ;;  %vm207_vm1 = vcmask 140288   ;;  %v210_v2 = vld [vmem:[%s180_s6 + $0x8] sm:$0xff] }
  0x4d   : > { %213 = vrot.lane.b32.xlu0 %v209_v0, %s695_s27  ;;  %205 = vst.msk [vmem:[#allocation2] sm:$0xff] %vm204_vm0, %v696_v1  ;;  %206 = vst.msk [vmem:[#allocation2 + $0x8] sm:$0xff] %vm204_vm0, %v696_v1  ;;  %s859_s12 = sld [smem:[#allocation4 + $0x2]]  ;;  %vm219_vm2 = vcmask 138248   ;;  %s697_s8 = smov 126   ;;  %vm239_vm3 = vcmask 1046528  }
  0x4e   : > { %208 = vst.msk [vmem:[#allocation2 + $0x10] sm:$0x3] %vm207_vm1, %v696_v1  ;;  %s500_s20 = sld [smem:[#allocation4 + $0x1]]  ;;  %s698_s9 = smov 127   ;;  %vm257_vm4 = vcmask 1045504   ;;  %vm385_vm5 = vcmask 130048  }
  0x4f   : > { %s501_s24 = sld [smem:[#allocation4 + $0x4]]  ;;  %s512_s11 = sshll.u32 %s746_s1, 8 }
  0x50   : > { %s502_s21 = sld [smem:[#allocation4 + $0x7]]  ;;  %s203_s13 = scalar_lea.vmem [#allocation9], %s496_s23 }
  0x51   : > { %215 = vrot.lane.b32.xlu0 %v210_v2, %s695_s27  ;;  %s504_s29 = sld [smem:[#allocation4 + $0x5]]  ;;  %s402_s28 = sshll.u32 %s203_s13, 4  ;;  %s897_s28 = int_to_ptr.vmem [resolvable:$true] %s402_s28 }
  0x52   : > { %s498_s30 = sld [smem:[#allocation4 + $0x3]]  ;;  %p959_p3 = scmp.ne.s32.totalorder %s950_s25, 0 }
  0x53   : > { %s505_s4 = sld [smem:[#allocation4 + $0x8]]  ;;  %v324_v5 = vstv %s859_s12  ;;  %s895_s12 = scalar_lea.hbm %s943_s3, %s512_s11 }
  0x54   : > { %v268_v6 = vstv %s500_s20  ;;  %s499_s7 = sld [smem:[#allocation4 + $0x6]]  ;;  %s389_s20 = scalar_lea.sflag [#allocation6], %s849_s18 }
  0x55   : > { %s862_s5 = sld [smem:[#allocation4]]  ;;  %v282_v8 = vstv %s501_s24  ;;  %s621_s24 = scalar_lea.vmem %s897_s28, 256 }
  0x56   : > { %v303_v12 = vstv %s502_s21  ;;  %s379_s10 = sld [smem:[#allocation3]]  ;;  %p622_p13 = scmp.ne.s32.totalorder %s897_s28, %s621_s24 }
  0x57   : > { %v338_v15 = vstv %s504_s29  ;;  %s699_s1 = smov [#allocation9]  }
  0x58   : > { %v232_v16 = vstv %s498_s30  ;;  %p623_p2 = pnand %p622_p13, %p959_p3  ;;  %s625_s23 = sshll.u32 %s699_s1, 4  ;;  %s626_s23 = int_to_ptr.vmem [resolvable:$false] %s625_s23 }
  0x59   : > { %v359_v20 = vstv %s505_s4  ;;  %s627_s21 = scalar_lea.vmem %s626_s23, 512  ;;  %p628_p8 = scmp.lt.s32.totalorder %s897_s28, %s626_s23 }
  0x5a   : > { %v250_v23 = vstv %s499_s7  ;;  %p624_p7 = pneg %p623_p2  ;;  %p629_p9 = scmp.lt.s32.totalorder %s627_s21, %s621_s24 }
  0x5b   : > { %v226_v26 = vstv %s862_s5 }
  0x5c   : > { %p630_p10 = por %p629_p9, %p628_p8 }
  0x5e   : > { %p631_p1 = pnand %p630_p10, %p624_p7 }
  0xbf   : > { %v214_v3 = vpop.permute.xlu0 %213 }
  0xc0   : > { %220 = vst.msk [vmem:[#allocation2 + $0x1] sm:$0xff] %vm219_vm2, %v214_v3 }
  0xc3   : > { %v216_v4 = vpop.permute.xlu0 %215 }
  0xc4   : > { %221 = vst.msk [vmem:[#allocation2 + $0x9] sm:$0xff] %vm219_vm2, %v216_v4 }
  0xc7   : > { %v222_v7 = vld [vmem:[#allocation2] sm:$0xff] }
  0xc8   : > { %v325_v9 = vmul.f32 %v324_v5, %v222_v7  ;;  %v269_v10 = vmul.f32 %v268_v6, %v222_v7  ;;  %v283_v11 = vmul.f32 %v282_v8, %v222_v7  ;;  %v304_v21 = vmul.f32 %v303_v12, %v222_v7 }
  0xc9   : > { %v233_v27 = vmul.f32 %v232_v16, %v222_v7  ;;  %v339_v28 = vmul.f32 %v338_v15, %v222_v7  ;;  %v360_v30 = vmul.f32 %v359_v20, %v222_v7  ;;  %v251_v34 = vmul.f32 %v250_v23, %v222_v7 }
  0xca   : > { %329 = vrot.lane.b32.xlu0 %v325_v9, %s697_s8  ;;  %273 = vrot.lane.b32.xlu1 %v269_v10, %s698_s9  ;;  %v289_v24 = vrot.slane %v283_v11, 1  ;;  %v310_v35 = vrot.slane %v304_v21, 2  ;;  %v227_v38 = vmul.f32 %v226_v26, %v222_v7 }
  0xcb   : > { %v223_v13 = vld [vmem:[#allocation2 + $0x8] sm:$0xff]  ;;  %v224_v14 = vld [vmem:[#allocation2 + $0x10] sm:$0x3]  ;;  %v240_v42 = vrot.slane %v233_v27, 1  ;;  %v258_v50 = vrot.slane %v251_v34, 2  ;;  %v345_v55 = vrot.slane %v339_v28, 1  ;;  %v380_v28 = vstv %s379_s10 }
  0xcc   : > { %v270_v17 = vmul.f32 %v268_v6, %v223_v13  ;;  %v284_v18 = vmul.f32 %v282_v8, %v223_v13  ;;  %v305_v19 = vmul.f32 %v303_v12, %v223_v13  ;;  %v285_v22 = vmul.f32 %v282_v8, %v224_v14 }
  0xcd   : > { %v340_v29 = vmul.f32 %v338_v15, %v223_v13  ;;  %v326_v32 = vmul.f32 %v324_v5, %v223_v13  ;;  %v306_v37 = vmul.f32 %v303_v12, %v224_v14  ;;  %v361_v39 = vmul.f32 %v359_v20, %v223_v13 }
  0xce   : > { %275 = vrot.lane.b32.xlu1 %v270_v17, %s698_s9  ;;  %v290_v25 = vrot.slane %v284_v18, 1  ;;  %v311_v33 = vrot.slane %v305_v19, 2  ;;  %v292_v36 = vrot.slane %v285_v22, 1  ;;  %v234_v40 = vmul.f32 %v232_v16, %v223_v13 }
  0xcf   : > { %v252_v41 = vmul.f32 %v250_v23, %v223_v13  ;;  %v346_v43 = vrot.slane %v340_v29, 1  ;;  %v341_v44 = vmul.f32 %v338_v15, %v224_v14  ;;  %v235_v45 = vmul.f32 %v232_v16, %v224_v14 }
  0xd0   : > { %v291_v31 = vsel %vm239_vm3, %v289_v24, %v290_v25  ;;  %v253_v46 = vmul.f32 %v250_v23, %v224_v14  ;;  %v312_v47 = vsel %vm257_vm4, %v310_v35, %v311_v33  ;;  %v241_v48 = vrot.slane %v234_v40, 1 }
  0xd1   : > { %294 = vrot.lane.b32.xlu0 %v291_v31, %s698_s9  ;;  %v259_v49 = vrot.slane %v252_v41, 2  ;;  %v293_v51 = vsel %vm239_vm3, %v290_v25, %v292_v36  ;;  %v313_v52 = vrot.slane %v306_v37, 2  ;;  %v243_v53 = vrot.slane %v235_v45, 1 }
  0xd2   : > { %331 = vrot.lane.b32.xlu1 %v326_v32, %s697_s8  ;;  %v261_v54 = vrot.slane %v253_v46, 2  ;;  %v242_v56 = vsel %vm239_vm3, %v240_v42, %v241_v48  ;;  %v228_v58 = vmul.f32 %v226_v26, %v223_v13  ;;  %v347_v62 = vsel %vm239_vm3, %v345_v55, %v346_v43 }
  0xd3   : > { %v260_v57 = vsel %vm257_vm4, %v258_v50, %v259_v49  ;;  %v247_v59 = vadd.f32 %v242_v56, %v227_v38  ;;  %v244_v60 = vsel %vm239_vm3, %v241_v48, %v243_v53  ;;  %v367_v63 = vrot.slane %v361_v39, 2 }
  0xd4   : > { %v262_v61 = vsel %vm257_vm4, %v259_v49, %v261_v54  ;;  %v248_v0 = vadd.f32 %v244_v60, %v228_v58  ;;  %v314_v1 = vsel %vm257_vm4, %v311_v33, %v313_v52  ;;  %v348_v2 = vrot.slane %v341_v44, 1 }
  0xd5   : > { %315 = vrot.lane.b32.xlu0 %v312_v47, %s698_s9  ;;  %v362_v3 = vmul.f32 %v359_v20, %v224_v14  ;;  %v265_v4 = vadd.f32 %v260_v57, %v247_v59  ;;  %v366_v5 = vrot.slane %v360_v30, 2 }
  0xd6   : > { %296 = vrot.lane.b32.xlu1 %v293_v51, %s698_s9  ;;  %v266_v6 = vadd.f32 %v262_v61, %v248_v0  ;;  %v349_v8 = vsel %vm239_vm3, %v346_v43, %v348_v2 }
  0xd7   : > { %v368_v7 = vsel %vm257_vm4, %v366_v5, %v367_v63  ;;  %v369_v9 = vrot.slane %v362_v3, 2 }
  0xd9   : > { %350 = vrot.lane.b32.xlu0 %v347_v62, %s697_s8  ;;  %v370_v10 = vsel %vm257_vm4, %v367_v63, %v369_v9 }
  0xda   : > { %317 = vrot.lane.b32.xlu1 %v314_v1, %s698_s9 }
  0xdd   : > { %371 = vrot.lane.b32.xlu0 %v368_v7, %s697_s8 }
  0xde   : > { %352 = vrot.lane.b32.xlu1 %v349_v8, %s697_s8 }
  0xe2   : > { %373 = vrot.lane.b32.xlu1 %v370_v10, %s697_s8 }
 0x13c   : > { %v274_v11 = vpop.permute.xlu1 %273  ;;  %v330_v12 = vpop.permute.xlu0 %329 }
 0x13d   : > { %v279_v15 = vadd.f32 %v274_v11, %v265_v4 }
 0x140   : > { %v276_v13 = vpop.permute.xlu1 %275 }
 0x141   : > { %v280_v21 = vadd.f32 %v276_v13, %v266_v6 }
 0x143   : > { %v295_v14 = vpop.permute.xlu0 %294 }
 0x144   : > { %v332_v16 = vpop.permute.xlu1 %331  ;;  %v300_v17 = vadd.f32 %v295_v14, %v279_v15 }
 0x147   : > { %v316_v18 = vpop.permute.xlu0 %315 }
 0x148   : > { %v321_v19 = vadd.f32 %v316_v18, %v300_v17  ;;  %v297_v20 = vpop.permute.xlu1 %296 }
 0x149   : > { %v301_v23 = vadd.f32 %v297_v20, %v280_v21 }
 0x14a   : > { %v335_v22 = vadd.f32 %v330_v12, %v321_v19 }
 0x14b   : > { %v351_v24 = vpop.permute.xlu0 %350 }
 0x14c   : > { %v318_v25 = vpop.permute.xlu1 %317  ;;  %v356_v27 = vadd.f32 %v351_v24, %v335_v22 }
 0x14d   : > { %v322_v26 = vadd.f32 %v318_v25, %v301_v23 }
 0x14f   : > { %v372_v29 = vpop.permute.xlu0 %371  ;;  %v336_v30 = vadd.f32 %v332_v16, %v322_v26 }
 0x150   : > { %v377_v31 = vadd.f32 %v372_v29, %v356_v27  ;;  %v353_v32 = vpop.permute.xlu1 %352 }
 0x151   : > { %v357_v34 = vadd.f32 %v353_v32, %v336_v30 }
 0x152   : > { %v381_v33 = vadd.f32 %v380_v28, %v377_v31 }
 0x154   : > { %v383_v35 = vmax.f32 %v381_v33, 0.0  ;;  %v374_v36 = vpop.permute.xlu1 %373 }
 0x155   : > { %v378_v37 = vadd.f32 %v374_v36, %v357_v34 }
 0x156   : > { %386 = vst.msk [vmem:[%s203_s13] sm:$0xff] %vm385_vm5, %v383_v35 }
 0x157   : > { %v382_v38 = vadd.f32 %v380_v28, %v378_v37 }
 0x159   : > { %v384_v39 = vmax.f32 %v382_v38, 0.0 }
 0x15b   : > { %387 = vst.msk [vmem:[%s203_s13 + $0x8] sm:$0xff] %vm385_vm5, %v384_v39 }
 0x15c   : > { %634 = shalt.err (!%p631_p1)
}
 0x15d   : > { %s635_s29 = scalar_lea.hbm %s895_s12, 256  ;;  %s639_s7 = scalar_lea.hbm %s943_s3, 512 }
 0x15e   : > { %p636_p4 = scmp.ne.s32.totalorder %s895_s12, %s635_s29  ;;  %p640_p12 = scmp.lt.s32.totalorder %s895_s12, %s943_s3 }
 0x15f   : > { %p641_p0 = scmp.lt.s32.totalorder %s639_s7, %s635_s29 }
 0x160   : > { %p637_p11 = pnand %p636_p4, %p959_p3 }
 0x161   : > { %p642_p6 = por %p641_p0, %p640_p12 }
 0x162   : > { %p638_p5 = pneg %p637_p11 }
 0x164   : > { %p643_p13 = pnand %p642_p6, %p638_p5 }
 0x166   : > { %646 = shalt.err (!%p643_p13)
}
 0x167   : > { %s700_s9 = smov 128   ;;  %s701_s10 = smov 8  }
 0x168   : > { %519 = dma.vmem_to_hbm [thread:$0]  (%p959_p3), %s897_s28, 256, %s895_s12, %s389_s20, %s700_s9, %s700_s9, %s701_s10  }
 0x169 PF: > { %s417_s11 = sand.u32 1, %s677_s14   ;;  %p960_p2 = scmp.ne.s32.totalorder %s951_s26, 0 }
 0x16a   : > { %p961_p7 = scmp.ge.s32.totalorder %s689_s17, 2  ;;  %s418_s13 = scalar_lea.sflag [#allocation6], %s417_s11 }
 0x16c   : > { %p530_p8 = pnand %p961_p7, %p960_p2 }
 0x16e   : > { %p531_p9 = pneg %p530_p8 }
 0x170   : > { %672 = dma.done.wait (%p531_p9), %s418_s13, 256  }
 0x171   : > { %674 = vsyncadd (%p531_p9), %s418_s13, 4294967040  ;;  %p18_p10 = scmp.ge.s32.totalorder %s750_s19, 4   ;;  %s962_s14 = smov %s681_s15 }
 0x172   : > { %s963_s15 = smov %s685_s16  ;;  %s964_s16 = smov %s762_s22 }
 0x173   : > { %s965_s17 = smov %s750_s19  ;;  %20 = sbr.rel (!%p18_p10) target bundleno = 8 (0x8), region = 82 }
 0x178   :  { %423 = vsyncpa [#allocation5], 1 }
 0x179   :  { %425 = vsyncpa [#allocation5 + $0x1], 1 }
 0x17a   :  { %426 = vsyncpa [#allocation6], 1 }
 0x17b   :  { %428 = vsyncpa [#allocation6 + $0x1], 1 }
 0x17c   :  { %429 = vsyncpa [#allocation7], 1 }
 0x17d   :  { %431 = vsyncpa [#allocation7 + $0x1], 1 }

</bundles_post_ra>
